<compile_context>
chip_gen: v7x
topology: tpu7x:2x2x1
jax: 0.10.0
libtpu: 0.0.40
codegen_flags: <defaults>
</compile_context>

<pallas_src>
import functools
import math

import jax
import jax.numpy as jnp
from jax.experimental import pallas as pl
from jax.experimental.pallas import tpu as pltpu


def _layer_norm(x, gamma, beta, eps=1e-5):
    mean = jnp.mean(x, axis=-1, keepdims=True)
    var = jnp.mean((x - mean) ** 2, axis=-1, keepdims=True)  # biased, like torch
    return (x - mean) * jax.lax.rsqrt(var + eps) * gamma + beta


def _selfatt_kernel(u_ref, i_ref, wa_ref, w2_ref, vec_ref, o_ref, *, num_heads):
    """One grid step = batch_block batch elements, all in VMEM.

    u_ref    : (bb, Su, D) user token rows (f32)
    i_ref    : (bb, Si, D) item token rows (f32)
    wa_ref   : (D, 3D + D + dff) = [Wqkv^T | Wout^T | W1^T]   (mm_dtype)
    w2_ref   : (dff, D)          = W2^T                       (mm_dtype)
    vec_ref  : (8, >=128) f32 rows = bqkv, bout, g1, be1, bb1, bb2, g2, be2
    o_ref    : (bb, S, D) f32
    """
    bb, su, D = u_ref.shape
    si = i_ref.shape[1]
    S = su + si
    rows = bb * S
    dff = w2_ref.shape[0]
    H = num_heads
    hd = D // H
    scale = 1.0 / math.sqrt(hd)
    mm_dtype = wa_ref.dtype          # bf16 by default, f32 if packed that way

    # Concatenate user/item inside the kernel (no HBM round-trip in the wrapper)
    x3 = jnp.concatenate([u_ref[...], i_ref[...]], axis=1).astype(jnp.float32)
    x = x3.reshape(rows, D)          # row-batched view for projections / FF

    def mm(a, b):                    # MXU matmul, f32 accumulate; b is mm_dtype
        return jnp.dot(a.astype(mm_dtype), b, preferred_element_type=jnp.float32)

    # ---- fused QKV projection, batched over every row in the block ----------
    qkv = mm(x, wa_ref[:, :3 * D]) + vec_ref[0:1, :3 * D]          # (rows, 3D)
    q3 = (qkv[:, :D] * scale).reshape(bb, S, D).astype(mm_dtype)
    k3 = qkv[:, D:2 * D].reshape(bb, S, D).astype(mm_dtype)
    v3 = qkv[:, 2 * D:].reshape(bb, S, D).astype(mm_dtype)

    # ---- per-batch attention (no block-diagonal mask); heads: static unroll --
    ctx_heads = []
    for h in range(H):
        sl = slice(h * hd, (h + 1) * hd)
        s = jnp.einsum('bqd,bkd->bqk', q3[..., sl], k3[..., sl],
                       preferred_element_type=jnp.float32)          # (bb, S, S)
        s = s - jnp.max(s, axis=-1, keepdims=True)
        p = jnp.exp(s)
        p = p * pl.reciprocal(jnp.sum(p, axis=-1, keepdims=True), approx=True)
        ctx_heads.append(
            jnp.einsum('bqk,bkd->bqd', p.astype(mm_dtype), v3[..., sl],
                       preferred_element_type=jnp.float32))          # (bb, S, hd)
    ctx = jnp.concatenate(ctx_heads, axis=-1).reshape(rows, D)       # (rows, D)

    # single K=D output projection (instead of H accumulating K=hd matmuls)
    attn = mm(ctx, wa_ref[:, 3 * D:4 * D]) + vec_ref[1:2, :D]

    x1 = _layer_norm(x + attn, vec_ref[2:3, :D], vec_ref[3:4, :D])

    # ---- feed-forward: Linear(D->dff) -> ReLU -> Linear(dff->D) -------------
    ff = jnp.maximum(mm(x1, wa_ref[:, 4 * D:4 * D + dff]) + vec_ref[4:5, :dff], 0.0)
    ff = mm(ff, w2_ref[...]) + vec_ref[5:6, :D]

    out = _layer_norm(x1 + ff, vec_ref[6:7, :D], vec_ref[7:8, :D])
    o_ref[...] = out.reshape(bb, S, D)


def self_att_forward(user_fea, item_fea, packed, num_heads,
                     batch_block=None, vmem_limit_bytes=None):
    user_fea = user_fea.astype(jnp.float32)
    item_fea = item_fea.astype(jnp.float32)
    B, Su, D = user_fea.shape
    Si = item_fea.shape[1]
    S = Su + Si
    wa, w2, vecs = packed["w_a"], packed["w2_t"], packed["vecs"]

    if batch_block is None:
        # v5e/v6e (1 TC): fold the whole batch into one grid step.
        # On v7x (2 TCs) prefer batch_block = B // 2 so both cores get a block.
        batch_block = B
    assert B % batch_block == 0
    grid_b = B // batch_block

    kernel = functools.partial(_selfatt_kernel, num_heads=num_heads)

    cp_kwargs = dict(dimension_semantics=("parallel",))
    if vmem_limit_bytes is not None:
        cp_kwargs["vmem_limit_bytes"] = vmem_limit_bytes

    out = pl.pallas_call(
        kernel,
        out_shape=jax.ShapeDtypeStruct((B, S, D), jnp.float32),
        grid_spec=pltpu.PrefetchScalarGridSpec(
            num_scalar_prefetch=0,
            grid=(grid_b,),
            in_specs=[
                pl.BlockSpec((batch_block, Su, D), lambda i: (i, 0, 0)),  # user
                pl.BlockSpec((batch_block, Si, D), lambda i: (i, 0, 0)),  # item
                pl.BlockSpec(wa.shape, lambda i: (0, 0)),    # packed weight slab
                pl.BlockSpec(w2.shape, lambda i: (0, 0)),    # W2^T
                pl.BlockSpec(vecs.shape, lambda i: (0, 0)),  # bias/gamma/beta slab
            ],
            out_specs=pl.BlockSpec((batch_block, S, D), lambda i: (i, 0, 0)),
        ),
        compiler_params=pltpu.CompilerParams(**cp_kwargs),
    )(user_fea, item_fea, wa, w2, vecs)
    return out


def init_params(key, dim, dff=128):
    ks = jax.random.split(key, 12)
    s = 0.05
    rn = lambda k, shape: jax.random.normal(k, shape, jnp.float32) * s
    return {
        # stored pre-transposed so the kernel computes x @ W^T as x @ W_t
        "wqkv_t": rn(ks[0], (3 * dim, dim)).T,
        "bqkv": rn(ks[1], (3 * dim,)).reshape(1, -1),
        "wout_t": rn(ks[2], (dim, dim)).T,
        "bout": rn(ks[3], (dim,)).reshape(1, -1),
        "g1": 1.0 + rn(ks[4], (dim,)).reshape(1, -1),
        "be1": rn(ks[5], (dim,)).reshape(1, -1),
        "w1_t": rn(ks[6], (dff, dim)).T,
        "bb1": rn(ks[7], (dff,)).reshape(1, -1),
        "w2_t": rn(ks[8], (dim, dff)).T,
        "bb2": rn(ks[9], (dim,)).reshape(1, -1),
        "g2": 1.0 + rn(ks[10], (dim,)).reshape(1, -1),
        "be2": rn(ks[11], (dim,)).reshape(1, -1),
    }


def pack_params(p, dim, dff, mm_dtype=jnp.bfloat16):
    """Pack 12 parameter tensors into 3 arrays (done once at setup).

    Weight slabs are stored in mm_dtype (bf16 default: native MXU operand type
    on v5e/v6e/v7x, half the weight DMA bytes).  Bias/LN vectors stay f32.
    """
    w_a = jnp.concatenate([p["wqkv_t"], p["wout_t"], p["w1_t"]],
                          axis=1).astype(mm_dtype)                # (D, 4D+dff)
    w2_t = p["w2_t"].astype(mm_dtype)                             # (dff, D)
    vec_w = max(3 * dim, dff, dim)
    vec_w = ((vec_w + 127) // 128) * 128

    def row(v):
        v = v.reshape(-1).astype(jnp.float32)
        return jnp.pad(v, (0, vec_w - v.shape[0]))

    vecs = jnp.stack([row(p["bqkv"]), row(p["bout"]), row(p["g1"]), row(p["be1"]),
                      row(p["bb1"]), row(p["bb2"]), row(p["g2"]), row(p["be2"])],
                     axis=0)
    return {"w_a": w_a, "w2_t": w2_t, "vecs": vecs}


def ref_forward(user_fea, item_fea, p, num_heads):
    x = jnp.concatenate([user_fea, item_fea], axis=1).astype(jnp.float32)  # (B,S,D)
    B, S, D = x.shape
    hd = D // num_heads
    qkv = x @ p["wqkv_t"] + p["bqkv"]
    q, k, v = qkv[..., :D], qkv[..., D:2 * D], qkv[..., 2 * D:]
    rs = lambda t: t.reshape(B, S, num_heads, hd).transpose(0, 2, 1, 3)
    q, k, v = rs(q) / math.sqrt(hd), rs(k), rs(v)
    s = jnp.einsum("bhqd,bhkd->bhqk", q, k)
    a = jax.nn.softmax(s, axis=-1)
    o = jnp.einsum("bhqk,bhkd->bhqd", a, v).transpose(0, 2, 1, 3).reshape(B, S, D)
    o = o @ p["wout_t"] + p["bout"]
    x1 = _layer_norm(x + o, p["g1"], p["be1"])
    ff = jnp.maximum(x1 @ p["w1_t"] + p["bb1"], 0.0) @ p["w2_t"] + p["bb2"]
    return _layer_norm(x1 + ff, p["g2"], p["be2"])


if __name__ == "__main__":
    dim, num_heads, dff = 32, 4, 128
    batch, seq_u, seq_i = 2, 4, 4

    key = jax.random.PRNGKey(0)
    kp, ku, ki = jax.random.split(key, 3)
    params = init_params(kp, dim, dff)
    user_fea = jax.random.normal(ku, (batch, seq_u, dim), jnp.float32)
    item_fea = jax.random.normal(ki, (batch, seq_i, dim), jnp.float32)

    ref = ref_forward(user_fea, item_fea, params, num_heads)

    # f32 weight path: tight tolerance (approx reciprocal ~1e-4 rel).
    packed_f32 = pack_params(params, dim, dff, mm_dtype=jnp.float32)
    out = jax.block_until_ready(
        self_att_forward(user_fea, item_fea, packed_f32, num_heads))
    assert out.shape == (batch, seq_u + seq_i, dim)
    assert jnp.allclose(out, ref, atol=2e-3, rtol=2e-3)

    # Multi-step grid (batch_block=1, grid=(2,)) — the v7x two-TensorCore shape.
    out_split = jax.block_until_ready(
        self_att_forward(user_fea, item_fea, packed_f32, num_heads, batch_block=1))
    assert jnp.allclose(out_split, ref, atol=2e-3, rtol=2e-3)

    # Default bf16 weight slabs + bf16 MXU operands, f32 accumulation.
    packed_bf16 = pack_params(params, dim, dff)
    out_bf16 = jax.block_until_ready(
        self_att_forward(user_fea, item_fea, packed_bf16, num_heads))
    assert jnp.allclose(out_bf16, ref, atol=5e-2, rtol=5e-2)

    print("KERNEL_OK")
</pallas_src>

<mosaic_0001>
module attributes {stable_mosaic.version = 11 : i64} {
  func.func @_selfatt_kernel(%arg0: i32, %arg1: memref<2x4x32xf32, #tpu.memory_space<vmem>>, %arg2: memref<2x4x32xf32, #tpu.memory_space<vmem>>, %arg3: memref<32x256xf32, #tpu.memory_space<vmem>>, %arg4: memref<128x32xf32, #tpu.memory_space<vmem>>, %arg5: memref<8x128xf32, #tpu.memory_space<vmem>>, %arg6: memref<2x8x32xf32, #tpu.memory_space<vmem>>) attributes {dimension_semantics = [#tpu.dimension_semantics<parallel>], iteration_bounds = array<i64: 1>, scalar_prefetch = 0 : i64, scratch_operands = 0 : i64, tpu.core_type = #tpu.core_type<tc>, window_params = [{transform_indices = @transform_0, window_bounds = array<i64: 2, 4, 32>}, {transform_indices = @transform_1, window_bounds = array<i64: 2, 4, 32>}, {pipeline_mode = #tpu.pipeline_mode<synchronous>, transform_indices = @transform_2, window_bounds = array<i64: 32, 256>}, {pipeline_mode = #tpu.pipeline_mode<synchronous>, transform_indices = @transform_3, window_bounds = array<i64: 128, 32>}, {pipeline_mode = #tpu.pipeline_mode<synchronous>, transform_indices = @transform_4, window_bounds = array<i64: 8, 128>}, {transform_indices = @transform_5, window_bounds = array<i64: 2, 8, 32>}]} {
    %c0 = arith.constant 0 : index
    %c0_0 = arith.constant 0 : index
    %c0_1 = arith.constant 0 : index
    %0 = vector.load %arg1[%c0, %c0_0, %c0_1] : memref<2x4x32xf32, #tpu.memory_space<vmem>>, vector<2x4x32xf32>
    %c0_2 = arith.constant 0 : index
    %c0_3 = arith.constant 0 : index
    %c0_4 = arith.constant 0 : index
    %1 = vector.load %arg2[%c0_2, %c0_3, %c0_4] : memref<2x4x32xf32, #tpu.memory_space<vmem>>, vector<2x4x32xf32>
    %2 = tpu.concatenate %0, %1 in 1 : vector<2x4x32xf32>, vector<2x4x32xf32> -> vector<2x8x32xf32>
    %3 = vector.shape_cast %2 : vector<2x8x32xf32> to vector<16x32xf32>
    %c0_5 = arith.constant 0 : index
    %c0_6 = arith.constant 0 : index
    %4 = vector.load %arg3[%c0_5, %c0_6] : memref<32x256xf32, #tpu.memory_space<vmem>>, vector<32x96xf32>
    %cst = arith.constant dense<0.000000e+00> : vector<16x96xf32>
    %5 = tpu.matmul %3, %4, %cst {dimension_numbers = #tpu.dot_dimension_numbers<[1], [0], [0], [1], [0, 0, 1, 1], [], []>} : vector<16x32xf32>, vector<32x96xf32>, vector<16x96xf32> -> vector<16x96xf32>
    %c0_7 = arith.constant 0 : index
    %c0_8 = arith.constant 0 : index
    %6 = vector.load %arg5[%c0_7, %c0_8] : memref<8x128xf32, #tpu.memory_space<vmem>>, vector<1x96xf32>
    %7 = vector.broadcast %6 : vector<1x96xf32> to vector<16x96xf32>
    %8 = arith.addf %5, %7 : vector<16x96xf32>
    %9 = vector.extract_strided_slice %8 {offsets = [0, 0], sizes = [16, 32], strides = [1, 1]} : vector<16x96xf32> to vector<16x32xf32>
    %cst_9 = arith.constant 0.353553385 : f32
    %10 = vector.broadcast %cst_9 : f32 to vector<16x32xf32>
    %11 = arith.mulf %9, %10 : vector<16x32xf32>
    %12 = vector.shape_cast %11 : vector<16x32xf32> to vector<2x8x32xf32>
    %13 = vector.extract_strided_slice %8 {offsets = [0, 32], sizes = [16, 32], strides = [1, 1]} : vector<16x96xf32> to vector<16x32xf32>
    %14 = vector.shape_cast %13 : vector<16x32xf32> to vector<2x8x32xf32>
    %15 = vector.extract_strided_slice %8 {offsets = [0, 64], sizes = [16, 32], strides = [1, 1]} : vector<16x96xf32> to vector<16x32xf32>
    %16 = vector.shape_cast %15 : vector<16x32xf32> to vector<2x8x32xf32>
    %17 = vector.extract_strided_slice %12 {offsets = [0, 0, 0], sizes = [2, 8, 8], strides = [1, 1, 1]} : vector<2x8x32xf32> to vector<2x8x8xf32>
    %18 = vector.extract_strided_slice %14 {offsets = [0, 0, 0], sizes = [2, 8, 8], strides = [1, 1, 1]} : vector<2x8x32xf32> to vector<2x8x8xf32>
    "tpu.trace_start"() <{level = 10 : i32, message = "bqd,bkd->bqk"}> : () -> ()
    %cst_10 = arith.constant dense<0.000000e+00> : vector<2x8x8xf32>
    %19 = tpu.matmul %17, %18, %cst_10 {dimension_numbers = #tpu.dot_dimension_numbers<[2], [2], [1], [1], [0, 0, 0, 1, 1, 1], [0], [0]>} : vector<2x8x8xf32>, vector<2x8x8xf32>, vector<2x8x8xf32> -> vector<2x8x8xf32>
    "tpu.trace_stop"() : () -> ()
    %cst_11 = arith.constant dense<0xFF800000> : vector<2x8xf32>
    %20 = vector.multi_reduction <maximumf>, %19, %cst_11 [2] : vector<2x8x8xf32> to vector<2x8xf32>
    %21 = vector.shape_cast %20 : vector<2x8xf32> to vector<2x8x1xf32>
    %22 = vector.broadcast %21 : vector<2x8x1xf32> to vector<2x8x8xf32>
    %23 = arith.subf %19, %22 : vector<2x8x8xf32>
    %24 = math.exp %23 : vector<2x8x8xf32>
    %cst_12 = arith.constant dense<0.000000e+00> : vector<2x8xf32>
    %25 = vector.multi_reduction <add>, %24, %cst_12 [2] : vector<2x8x8xf32> to vector<2x8xf32>
    %26 = vector.shape_cast %25 : vector<2x8xf32> to vector<2x8x1xf32>
    %27 = tpu.reciprocal %26 {approx = true} : vector<2x8x1xf32> -> vector<2x8x1xf32>
    %28 = vector.broadcast %27 : vector<2x8x1xf32> to vector<2x8x8xf32>
    %29 = arith.mulf %24, %28 : vector<2x8x8xf32>
    %30 = vector.extract_strided_slice %16 {offsets = [0, 0, 0], sizes = [2, 8, 8], strides = [1, 1, 1]} : vector<2x8x32xf32> to vector<2x8x8xf32>
    "tpu.trace_start"() <{level = 10 : i32, message = "bqk,bkd->bqd"}> : () -> ()
    %cst_13 = arith.constant dense<0.000000e+00> : vector<2x8x8xf32>
    %31 = tpu.matmul %29, %30, %cst_13 {dimension_numbers = #tpu.dot_dimension_numbers<[2], [1], [1], [2], [0, 0, 0, 1, 1, 2], [0], [0]>} : vector<2x8x8xf32>, vector<2x8x8xf32>, vector<2x8x8xf32> -> vector<2x8x8xf32>
    "tpu.trace_stop"() : () -> ()
    %32 = vector.extract_strided_slice %12 {offsets = [0, 0, 8], sizes = [2, 8, 8], strides = [1, 1, 1]} : vector<2x8x32xf32> to vector<2x8x8xf32>
    %33 = vector.extract_strided_slice %14 {offsets = [0, 0, 8], sizes = [2, 8, 8], strides = [1, 1, 1]} : vector<2x8x32xf32> to vector<2x8x8xf32>
    "tpu.trace_start"() <{level = 10 : i32, message = "bqd,bkd->bqk"}> : () -> ()
    %cst_14 = arith.constant dense<0.000000e+00> : vector<2x8x8xf32>
    %34 = tpu.matmul %32, %33, %cst_14 {dimension_numbers = #tpu.dot_dimension_numbers<[2], [2], [1], [1], [0, 0, 0, 1, 1, 1], [0], [0]>} : vector<2x8x8xf32>, vector<2x8x8xf32>, vector<2x8x8xf32> -> vector<2x8x8xf32>
    "tpu.trace_stop"() : () -> ()
    %cst_15 = arith.constant dense<0xFF800000> : vector<2x8xf32>
    %35 = vector.multi_reduction <maximumf>, %34, %cst_15 [2] : vector<2x8x8xf32> to vector<2x8xf32>
    %36 = vector.shape_cast %35 : vector<2x8xf32> to vector<2x8x1xf32>
    %37 = vector.broadcast %36 : vector<2x8x1xf32> to vector<2x8x8xf32>
    %38 = arith.subf %34, %37 : vector<2x8x8xf32>
    %39 = math.exp %38 : vector<2x8x8xf32>
    %cst_16 = arith.constant dense<0.000000e+00> : vector<2x8xf32>
    %40 = vector.multi_reduction <add>, %39, %cst_16 [2] : vector<2x8x8xf32> to vector<2x8xf32>
    %41 = vector.shape_cast %40 : vector<2x8xf32> to vector<2x8x1xf32>
    %42 = tpu.reciprocal %41 {approx = true} : vector<2x8x1xf32> -> vector<2x8x1xf32>
    %43 = vector.broadcast %42 : vector<2x8x1xf32> to vector<2x8x8xf32>
    %44 = arith.mulf %39, %43 : vector<2x8x8xf32>
    %45 = vector.extract_strided_slice %16 {offsets = [0, 0, 8], sizes = [2, 8, 8], strides = [1, 1, 1]} : vector<2x8x32xf32> to vector<2x8x8xf32>
    "tpu.trace_start"() <{level = 10 : i32, message = "bqk,bkd->bqd"}> : () -> ()
    %cst_17 = arith.constant dense<0.000000e+00> : vector<2x8x8xf32>
    %46 = tpu.matmul %44, %45, %cst_17 {dimension_numbers = #tpu.dot_dimension_numbers<[2], [1], [1], [2], [0, 0, 0, 1, 1, 2], [0], [0]>} : vector<2x8x8xf32>, vector<2x8x8xf32>, vector<2x8x8xf32> -> vector<2x8x8xf32>
    "tpu.trace_stop"() : () -> ()
    %47 = vector.extract_strided_slice %12 {offsets = [0, 0, 16], sizes = [2, 8, 8], strides = [1, 1, 1]} : vector<2x8x32xf32> to vector<2x8x8xf32>
    %48 = vector.extract_strided_slice %14 {offsets = [0, 0, 16], sizes = [2, 8, 8], strides = [1, 1, 1]} : vector<2x8x32xf32> to vector<2x8x8xf32>
    "tpu.trace_start"() <{level = 10 : i32, message = "bqd,bkd->bqk"}> : () -> ()
    %cst_18 = arith.constant dense<0.000000e+00> : vector<2x8x8xf32>
    %49 = tpu.matmul %47, %48, %cst_18 {dimension_numbers = #tpu.dot_dimension_numbers<[2], [2], [1], [1], [0, 0, 0, 1, 1, 1], [0], [0]>} : vector<2x8x8xf32>, vector<2x8x8xf32>, vector<2x8x8xf32> -> vector<2x8x8xf32>
    "tpu.trace_stop"() : () -> ()
    %cst_19 = arith.constant dense<0xFF800000> : vector<2x8xf32>
    %50 = vector.multi_reduction <maximumf>, %49, %cst_19 [2] : vector<2x8x8xf32> to vector<2x8xf32>
    %51 = vector.shape_cast %50 : vector<2x8xf32> to vector<2x8x1xf32>
    %52 = vector.broadcast %51 : vector<2x8x1xf32> to vector<2x8x8xf32>
    %53 = arith.subf %49, %52 : vector<2x8x8xf32>
    %54 = math.exp %53 : vector<2x8x8xf32>
    %cst_20 = arith.constant dense<0.000000e+00> : vector<2x8xf32>
    %55 = vector.multi_reduction <add>, %54, %cst_20 [2] : vector<2x8x8xf32> to vector<2x8xf32>
    %56 = vector.shape_cast %55 : vector<2x8xf32> to vector<2x8x1xf32>
    %57 = tpu.reciprocal %56 {approx = true} : vector<2x8x1xf32> -> vector<2x8x1xf32>
    %58 = vector.broadcast %57 : vector<2x8x1xf32> to vector<2x8x8xf32>
    %59 = arith.mulf %54, %58 : vector<2x8x8xf32>
    %60 = vector.extract_strided_slice %16 {offsets = [0, 0, 16], sizes = [2, 8, 8], strides = [1, 1, 1]} : vector<2x8x32xf32> to vector<2x8x8xf32>
    "tpu.trace_start"() <{level = 10 : i32, message = "bqk,bkd->bqd"}> : () -> ()
    %cst_21 = arith.constant dense<0.000000e+00> : vector<2x8x8xf32>
    %61 = tpu.matmul %59, %60, %cst_21 {dimension_numbers = #tpu.dot_dimension_numbers<[2], [1], [1], [2], [0, 0, 0, 1, 1, 2], [0], [0]>} : vector<2x8x8xf32>, vector<2x8x8xf32>, vector<2x8x8xf32> -> vector<2x8x8xf32>
    "tpu.trace_stop"() : () -> ()
    %62 = vector.extract_strided_slice %12 {offsets = [0, 0, 24], sizes = [2, 8, 8], strides = [1, 1, 1]} : vector<2x8x32xf32> to vector<2x8x8xf32>
    %63 = vector.extract_strided_slice %14 {offsets = [0, 0, 24], sizes = [2, 8, 8], strides = [1, 1, 1]} : vector<2x8x32xf32> to vector<2x8x8xf32>
    "tpu.trace_start"() <{level = 10 : i32, message = "bqd,bkd->bqk"}> : () -> ()
    %cst_22 = arith.constant dense<0.000000e+00> : vector<2x8x8xf32>
    %64 = tpu.matmul %62, %63, %cst_22 {dimension_numbers = #tpu.dot_dimension_numbers<[2], [2], [1], [1], [0, 0, 0, 1, 1, 1], [0], [0]>} : vector<2x8x8xf32>, vector<2x8x8xf32>, vector<2x8x8xf32> -> vector<2x8x8xf32>
    "tpu.trace_stop"() : () -> ()
    %cst_23 = arith.constant dense<0xFF800000> : vector<2x8xf32>
    %65 = vector.multi_reduction <maximumf>, %64, %cst_23 [2] : vector<2x8x8xf32> to vector<2x8xf32>
    %66 = vector.shape_cast %65 : vector<2x8xf32> to vector<2x8x1xf32>
    %67 = vector.broadcast %66 : vector<2x8x1xf32> to vector<2x8x8xf32>
    %68 = arith.subf %64, %67 : vector<2x8x8xf32>
    %69 = math.exp %68 : vector<2x8x8xf32>
    %cst_24 = arith.constant dense<0.000000e+00> : vector<2x8xf32>
    %70 = vector.multi_reduction <add>, %69, %cst_24 [2] : vector<2x8x8xf32> to vector<2x8xf32>
    %71 = vector.shape_cast %70 : vector<2x8xf32> to vector<2x8x1xf32>
    %72 = tpu.reciprocal %71 {approx = true} : vector<2x8x1xf32> -> vector<2x8x1xf32>
    %73 = vector.broadcast %72 : vector<2x8x1xf32> to vector<2x8x8xf32>
    %74 = arith.mulf %69, %73 : vector<2x8x8xf32>
    %75 = vector.extract_strided_slice %16 {offsets = [0, 0, 24], sizes = [2, 8, 8], strides = [1, 1, 1]} : vector<2x8x32xf32> to vector<2x8x8xf32>
    "tpu.trace_start"() <{level = 10 : i32, message = "bqk,bkd->bqd"}> : () -> ()
    %cst_25 = arith.constant dense<0.000000e+00> : vector<2x8x8xf32>
    %76 = tpu.matmul %74, %75, %cst_25 {dimension_numbers = #tpu.dot_dimension_numbers<[2], [1], [1], [2], [0, 0, 0, 1, 1, 2], [0], [0]>} : vector<2x8x8xf32>, vector<2x8x8xf32>, vector<2x8x8xf32> -> vector<2x8x8xf32>
    "tpu.trace_stop"() : () -> ()
    %77 = tpu.concatenate %31, %46, %61, %76 in 2 : vector<2x8x8xf32>, vector<2x8x8xf32>, vector<2x8x8xf32>, vector<2x8x8xf32> -> vector<2x8x32xf32>
    %78 = vector.shape_cast %77 : vector<2x8x32xf32> to vector<16x32xf32>
    %c0_26 = arith.constant 0 : index
    %c96 = arith.constant 96 : index
    %79 = vector.load %arg3[%c0_26, %c96] : memref<32x256xf32, #tpu.memory_space<vmem>>, vector<32x32xf32>
    %cst_27 = arith.constant dense<0.000000e+00> : vector<16x32xf32>
    %80 = tpu.matmul %78, %79, %cst_27 {dimension_numbers = #tpu.dot_dimension_numbers<[1], [0], [0], [1], [0, 0, 1, 1], [], []>} : vector<16x32xf32>, vector<32x32xf32>, vector<16x32xf32> -> vector<16x32xf32>
    %c1 = arith.constant 1 : index
    %c0_28 = arith.constant 0 : index
    %81 = vector.load %arg5[%c1, %c0_28] : memref<8x128xf32, #tpu.memory_space<vmem>>, vector<1x32xf32>
    %82 = vector.broadcast %81 : vector<1x32xf32> to vector<16x32xf32>
    %83 = arith.addf %80, %82 : vector<16x32xf32>
    %84 = arith.addf %3, %83 : vector<16x32xf32>
    %c2 = arith.constant 2 : index
    %c0_29 = arith.constant 0 : index
    %85 = vector.load %arg5[%c2, %c0_29] : memref<8x128xf32, #tpu.memory_space<vmem>>, vector<1x32xf32>
    %c3 = arith.constant 3 : index
    %c0_30 = arith.constant 0 : index
    %86 = vector.load %arg5[%c3, %c0_30] : memref<8x128xf32, #tpu.memory_space<vmem>>, vector<1x32xf32>
    %cst_31 = arith.constant dense<0.000000e+00> : vector<16xf32>
    %87 = vector.multi_reduction <add>, %84, %cst_31 [1] : vector<16x32xf32> to vector<16xf32>
    %88 = vector.shape_cast %87 : vector<16xf32> to vector<16x1xf32>
    %cst_32 = arith.constant 3.200000e+01 : f32
    %89 = vector.broadcast %cst_32 : f32 to vector<16x1xf32>
    %90 = arith.divf %88, %89 : vector<16x1xf32>
    %91 = vector.broadcast %90 : vector<16x1xf32> to vector<16x32xf32>
    %92 = arith.subf %84, %91 : vector<16x32xf32>
    %93 = arith.mulf %92, %92 : vector<16x32xf32>
    %cst_33 = arith.constant dense<0.000000e+00> : vector<16xf32>
    %94 = vector.multi_reduction <add>, %93, %cst_33 [1] : vector<16x32xf32> to vector<16xf32>
    %95 = vector.shape_cast %94 : vector<16xf32> to vector<16x1xf32>
    %cst_34 = arith.constant 3.200000e+01 : f32
    %96 = vector.broadcast %cst_34 : f32 to vector<16x1xf32>
    %97 = arith.divf %95, %96 : vector<16x1xf32>
    %98 = vector.broadcast %90 : vector<16x1xf32> to vector<16x32xf32>
    %99 = arith.subf %84, %98 : vector<16x32xf32>
    %cst_35 = arith.constant 9.99999974E-6 : f32
    %100 = vector.broadcast %cst_35 : f32 to vector<16x1xf32>
    %101 = arith.addf %97, %100 : vector<16x1xf32>
    %102 = math.rsqrt %101 : vector<16x1xf32>
    %103 = vector.broadcast %102 : vector<16x1xf32> to vector<16x32xf32>
    %104 = arith.mulf %99, %103 : vector<16x32xf32>
    %105 = vector.broadcast %85 : vector<1x32xf32> to vector<16x32xf32>
    %106 = arith.mulf %104, %105 : vector<16x32xf32>
    %107 = vector.broadcast %86 : vector<1x32xf32> to vector<16x32xf32>
    %108 = arith.addf %106, %107 : vector<16x32xf32>
    %c0_36 = arith.constant 0 : index
    %c128 = arith.constant 128 : index
    %109 = vector.load %arg3[%c0_36, %c128] : memref<32x256xf32, #tpu.memory_space<vmem>>, vector<32x128xf32>
    %cst_37 = arith.constant dense<0.000000e+00> : vector<16x128xf32>
    %110 = tpu.matmul %108, %109, %cst_37 {dimension_numbers = #tpu.dot_dimension_numbers<[1], [0], [0], [1], [0, 0, 1, 1], [], []>} : vector<16x32xf32>, vector<32x128xf32>, vector<16x128xf32> -> vector<16x128xf32>
    %c4 = arith.constant 4 : index
    %c0_38 = arith.constant 0 : index
    %111 = vector.load %arg5[%c4, %c0_38] : memref<8x128xf32, #tpu.memory_space<vmem>>, vector<1x128xf32>
    %112 = vector.broadcast %111 : vector<1x128xf32> to vector<16x128xf32>
    %113 = arith.addf %110, %112 : vector<16x128xf32>
    %cst_39 = arith.constant 0.000000e+00 : f32
    %114 = vector.broadcast %cst_39 : f32 to vector<16x128xf32>
    %115 = arith.maximumf %113, %114 : vector<16x128xf32>
    %c0_40 = arith.constant 0 : index
    %c0_41 = arith.constant 0 : index
    %116 = vector.load %arg4[%c0_40, %c0_41] : memref<128x32xf32, #tpu.memory_space<vmem>>, vector<128x32xf32>
    %cst_42 = arith.constant dense<0.000000e+00> : vector<16x32xf32>
    %117 = tpu.matmul %115, %116, %cst_42 {dimension_numbers = #tpu.dot_dimension_numbers<[1], [0], [0], [1], [0, 0, 1, 1], [], []>} : vector<16x128xf32>, vector<128x32xf32>, vector<16x32xf32> -> vector<16x32xf32>
    %c5 = arith.constant 5 : index
    %c0_43 = arith.constant 0 : index
    %118 = vector.load %arg5[%c5, %c0_43] : memref<8x128xf32, #tpu.memory_space<vmem>>, vector<1x32xf32>
    %119 = vector.broadcast %118 : vector<1x32xf32> to vector<16x32xf32>
    %120 = arith.addf %117, %119 : vector<16x32xf32>
    %121 = arith.addf %108, %120 : vector<16x32xf32>
    %c6 = arith.constant 6 : index
    %c0_44 = arith.constant 0 : index
    %122 = vector.load %arg5[%c6, %c0_44] : memref<8x128xf32, #tpu.memory_space<vmem>>, vector<1x32xf32>
    %c7 = arith.constant 7 : index
    %c0_45 = arith.constant 0 : index
    %123 = vector.load %arg5[%c7, %c0_45] : memref<8x128xf32, #tpu.memory_space<vmem>>, vector<1x32xf32>
    %cst_46 = arith.constant dense<0.000000e+00> : vector<16xf32>
    %124 = vector.multi_reduction <add>, %121, %cst_46 [1] : vector<16x32xf32> to vector<16xf32>
    %125 = vector.shape_cast %124 : vector<16xf32> to vector<16x1xf32>
    %cst_47 = arith.constant 3.200000e+01 : f32
    %126 = vector.broadcast %cst_47 : f32 to vector<16x1xf32>
    %127 = arith.divf %125, %126 : vector<16x1xf32>
    %128 = vector.broadcast %127 : vector<16x1xf32> to vector<16x32xf32>
    %129 = arith.subf %121, %128 : vector<16x32xf32>
    %130 = arith.mulf %129, %129 : vector<16x32xf32>
    %cst_48 = arith.constant dense<0.000000e+00> : vector<16xf32>
    %131 = vector.multi_reduction <add>, %130, %cst_48 [1] : vector<16x32xf32> to vector<16xf32>
    %132 = vector.shape_cast %131 : vector<16xf32> to vector<16x1xf32>
    %cst_49 = arith.constant 3.200000e+01 : f32
    %133 = vector.broadcast %cst_49 : f32 to vector<16x1xf32>
    %134 = arith.divf %132, %133 : vector<16x1xf32>
    %135 = vector.broadcast %127 : vector<16x1xf32> to vector<16x32xf32>
    %136 = arith.subf %121, %135 : vector<16x32xf32>
    %cst_50 = arith.constant 9.99999974E-6 : f32
    %137 = vector.broadcast %cst_50 : f32 to vector<16x1xf32>
    %138 = arith.addf %134, %137 : vector<16x1xf32>
    %139 = math.rsqrt %138 : vector<16x1xf32>
    %140 = vector.broadcast %139 : vector<16x1xf32> to vector<16x32xf32>
    %141 = arith.mulf %136, %140 : vector<16x32xf32>
    %142 = vector.broadcast %122 : vector<1x32xf32> to vector<16x32xf32>
    %143 = arith.mulf %141, %142 : vector<16x32xf32>
    %144 = vector.broadcast %123 : vector<1x32xf32> to vector<16x32xf32>
    %145 = arith.addf %143, %144 : vector<16x32xf32>
    %146 = vector.shape_cast %145 : vector<16x32xf32> to vector<2x8x32xf32>
    %c0_51 = arith.constant 0 : index
    %c0_52 = arith.constant 0 : index
    %c0_53 = arith.constant 0 : index
    %147 = vector.load %arg6[%c0_51, %c0_52, %c0_53] : memref<2x8x32xf32, #tpu.memory_space<vmem>>, vector<2x8x32xf32>
    tpu.vector_store %arg6[%c0_51, %c0_52, %c0_53], %146 {strides = array<i32>} : memref<2x8x32xf32, #tpu.memory_space<vmem>>, vector<2x8x32xf32>,
    return
  }
  func.func @transform_0(%arg0: i32) -> (i32, i32, i32) {
    %c0_i32 = arith.constant 0 : i32
    %c0_i32_0 = arith.constant 0 : i32
    %c0_i32_1 = arith.constant 0 : i32
    return %arg0, %c0_i32, %c0_i32_0 : i32, i32, i32
  }
  func.func @transform_1(%arg0: i32) -> (i32, i32, i32) {
    %c0_i32 = arith.constant 0 : i32
    %c0_i32_0 = arith.constant 0 : i32
    %c0_i32_1 = arith.constant 0 : i32
    return %arg0, %c0_i32, %c0_i32_0 : i32, i32, i32
  }
  func.func @transform_2(%arg0: i32) -> (i32, i32) {
    %c0_i32 = arith.constant 0 : i32
    %c0_i32_0 = arith.constant 0 : i32
    %c0_i32_1 = arith.constant 0 : i32
    return %c0_i32, %c0_i32_0 : i32, i32
  }
  func.func @transform_3(%arg0: i32) -> (i32, i32) {
    %c0_i32 = arith.constant 0 : i32
    %c0_i32_0 = arith.constant 0 : i32
    %c0_i32_1 = arith.constant 0 : i32
    return %c0_i32, %c0_i32_0 : i32, i32
  }
  func.func @transform_4(%arg0: i32) -> (i32, i32) {
    %c0_i32 = arith.constant 0 : i32
    %c0_i32_0 = arith.constant 0 : i32
    %c0_i32_1 = arith.constant 0 : i32
    return %c0_i32, %c0_i32_0 : i32, i32
  }
  func.func @transform_5(%arg0: i32) -> (i32, i32, i32) {
    %c0_i32 = arith.constant 0 : i32
    %c0_i32_0 = arith.constant 0 : i32
    %c0_i32_1 = arith.constant 0 : i32
    return %arg0, %c0_i32, %c0_i32_0 : i32, i32, i32
  }
}

</mosaic_0001>

<bundles_post_ra>
// kernel: tpu_custom_call.1
= control target key start
LH: loop header
LB: loop body
LE: loop exit
PB: predicated region body
PF: predicated region fallthrough
CT: control target
= control target key end

     0   :  { %vm31_vm0 = vcmask 1043456   ;;  %vm43_vm1 = vcmask 261120   ;;  %s2633_s0 = inlined_call_operand.vmem [shape: f32[2,4,32], index: 0, kind: input, shape index: {}]   ;;  %s2634_s1 = inlined_call_operand.vmem [shape: f32[2,4,32], index: 1, kind: input, shape index: {}]   ;;  %s2635_s2 = inlined_call_operand.vmem [shape: f32[32,256], index: 2, kind: input, shape index: {}]   ;;  %s2636_s3 = inlined_call_operand.vmem [shape: f32[128,32], index: 3, kind: input, shape index: {}]   ;;  %s2637_s4 = inlined_call_operand.vmem [shape: f32[8,128], index: 4, kind: input, shape index: {}]   ;;  %s2638_s5 = inlined_call_operand.hbm [shape: f32[2,8,32], index: 5, kind: output, shape index: {}]  }
   0x1   :  { %v2332_v0 = vld [vmem:[%s2635_s2] sm:$0xff]  ;;  %v2337_v1 = vld [vmem:[%s2635_s2 + $0x10] sm:$0xff] }
   0x2   :  { %v2342_v2 = vld [vmem:[%s2635_s2 + $0x20] sm:$0xff]  ;;  %v2131_v3 = vpack.c.bf16 %v2337_v1, %v2332_v0  ;;  %v2349_v4 = vld [vmem:[%s2635_s2 + $0x30] sm:$0xff] }
   0x3   :  { %v21_v5 = vld [vmem:[%s2633_s0] sm:$0xf]  ;;  %v2135_v7 = vpack.c.bf16 %v2349_v4, %v2342_v2  ;;  %v24_v9 = vld [vmem:[%s2634_s1 + $0x4] sm:$0xf] }
   0x4   :  { %v23_v6 = vld [vmem:[%s2634_s1] sm:$0xf]  ;;  %2132 = vmatprep.subr.bf16.mxu1 %v2131_v3 }
   0x5   :  { %v27_v8 = vrot.slane %v23_v6, 4 }
   0x6   :  { %10 = vsyncpa [#allocation3], 0  ;;  %2134 = vmatpush3.bf16.msra.mxu1 %v2131_v3  ;;  %v28_v11 = vrot.slane %v24_v9, 4  ;;  %v22_v12 = vld [vmem:[%s2633_s0 + $0x4] sm:$0xf]  ;;  %v2280_v14 = vmov 0.0  }
   0x7   :  { %v2362_v10 = vsel %vm31_vm0, %v21_v5, %v27_v8  ;;  %2136 = vmatprep.subr.bf16.mxu1 %v2135_v7  ;;  %2004 = vmatprep.subr.mxu0 %v2280_v14  ;;  %vm2281_vm2 = vmmov 0   ;;  %v1877_v15 = vld [vmem:[%s2637_s4] ss:$0 sm:$0xff]  ;;  %s2282_s9 = smov 96   ;;  %vm130_vm3 = vcmask 64512   ;;  %s2283_s10 = smov 64  }
   0x8   :  { %1991 = vmatprep.mubr.msk.f32.mxu1 %vm43_vm1, %v2362_v10  ;;  %v2369_v13 = vsel %vm31_vm0, %v22_v12, %v28_v11  ;;  %2006 = vmatprep.mubr.msk.f32.mxu0 %vm2281_vm2, %v2280_v14  ;;  %s2284_s11 = smov 88   ;;  %s2285_s12 = smov 120   ;;  %vm1477_vm4 = vcmask 195584   ;;  %vm1474_vm5 = vcmask 130048  }
   0x9   :  { %s2286_s13 = smov 56   ;;  %s2287_s14 = smov 80  }
   0xa   :  { %2138 = vmatpush3.bf16.msra.mxu1 %v2135_v7  ;;  %s2288_s15 = smov 112   ;;  %s2289_s16 = smov 48  }
   0xb   :  { %1994 = vmatprep.subr.mxu1 %v2280_v14  ;;  %s2290_s17 = smov 72   ;;  %s2291_s18 = smov 104  }
   0xc   :  { %s2292_s19 = smov 40   ;;  %s2293_s20 = smov 32  }
   0xd   :  { %1992 = vmatmul.mubr.msk.f32.vlgmr.msra.gmra.mrb[0].mxu1 %vm43_vm1, %v2369_v13  ;;  %s2294_s21 = smov 8   ;;  %s2295_s22 = smov 16  }
   0xe   :  { %1996 = vmatprep.mubr.msk.f32.mxu1 %vm2281_vm2, %v2280_v14  ;;  %s2296_s23 = smov 24  }
  0xe0   :  { %v1993_v16 = vpop.f32.mrb[0].mxu1 }
  0xe1   :  { %v116_v17 = vpop.f32.mrb[1].mxu1  ;;  %v2385_v19 = vadd.f32 %v1993_v16, %v1877_v15 }
  0xe2   :  { %v2382_v18 = vadd.f32 %v1877_v15, %v116_v17 }
  0xe3   :  { %v2399_v23 = vmul.f32 0.35355338, %v2385_v19 }
  0xe4   :  { %128 = vrot.lane.b32.xlu0 %v2382_v18, %s2282_s9  ;;  %v2391_v21 = vmul.f32 0.35355338, %v2382_v18 }
  0xe8   :  { %207 = vrot.lane.b32.xlu0 %v2385_v19, %s2282_s9 }
 0x156   :  { %v129_v20 = vpop.permute.xlu0 %128 }
 0x157   :  { %1995 = vmatpush3.xpose.msk.msra.mxu1 %vm130_vm3, %v129_v20 }
 0x158   :  { %1999 = vmatprep.subr.mxu1 %v2280_v14 }
 0x15a   :  { %v208_v22 = vpop.permute.xlu0 %207  ;;  %1997 = vmatmul.mubr.msk.f32.vlgmr.msra.gmra.mrb[2].mxu1 %vm130_vm3, %v2391_v21 }
 0x15b   :  { %2000 = vmatpush3.xpose.msk.msra.mxu1 %vm130_vm3, %v208_v22  ;;  %2001 = vmatprep.mubr.msk.f32.mxu1 %vm2281_vm2, %v2280_v14 }
 0x15c   :  { %2009 = vmatprep.subr.mxu1 %v2280_v14 }
 0x15e   :  { %2002 = vmatmul.mubr.msk.f32.vlgmr.msra.gmra.mrb[4].mxu1 %vm130_vm3, %v2399_v23 }
 0x15f   :  { %2011 = vmatprep.mubr.msk.f32.mxu1 %vm2281_vm2, %v2280_v14 }
 0x22d   :  { %v202_v24 = vpop.f32.mrb[2].mxu1 }
 0x22e   :  { %v1998_v25 = vpop.f32.mrb[3].mxu1  ;;  %v284_v26 = vsel %vm130_vm3, %v202_v24, -inf }
 0x22f   :  { %285 = vmax.xlane.f32.xlu1 %v284_v26 }
 0x231   :  { %v280_v27 = vpop.f32.mrb[4].mxu1 }
 0x232   :  { %v2003_v28 = vpop.f32.mrb[5].mxu1  ;;  %v287_v29 = vsel %vm130_vm3, %v280_v27, -inf }
 0x233   :  { %288 = vmax.xlane.f32.xlu1 %v287_v29 }
 0x244   :  { %306 = vrot.lane.b32.xlu1 %v2382_v18, %s2283_s10 }
 0x248   :  { %382 = vrot.lane.b32.xlu1 %v2385_v19, %s2283_s10 }
 0x24c   :  { %460 = vrot.lane.b32.xlu1 %v2382_v18, %s2284_s11 }
 0x250   :  { %538 = vrot.lane.b32.xlu1 %v2385_v19, %s2284_s11 }
 0x2bc   :  { %v286_v30 = vpop.xlane.xlu1 %285 }
 0x2bd   :  { %v290_v31 = vsub.f32 %v202_v24, %v286_v30 }
 0x2bf   :  { %v292_v32 = vmul.f32 1.442695, %v290_v31 }
 0x2c0   :  { %v289_v33 = vpop.xlane.xlu1 %288 }
 0x2c1   :  { %2216 = vpow2.f32 %v292_v32  ;;  %v291_v34 = vsub.f32 %v280_v27, %v289_v33 }
 0x2c3   :  { %v294_v35 = vmul.f32 1.442695, %v291_v34 }
 0x2c4   :  { %v307_v36 = vpop.permute.xlu1 %306 }
 0x2c5   :  { %2218 = vpow2.f32 %v294_v35  ;;  %2005 = vmatpush3.msra.mxu0 %v307_v36 }
 0x2c6   :  { %2014 = vmatprep.subr.mxu0 %v2280_v14 }
 0x2c8   :  { %v383_v37 = vpop.permute.xlu1 %382 }
 0x2c9   :  { %2010 = vmatpush3.msra.mxu1 %v383_v37 }
 0x2ca   :  { %2019 = vmatprep.subr.mxu1 %v2280_v14 }
 0x2cb   :  { %v2217_v38 = vpop.eup %2216 }
 0x2cc   :  { %v296_v39 = vsel %vm130_vm3, %v2217_v38, 0.0  ;;  %v461_v42 = vpop.permute.xlu1 %460 }
 0x2cd   :  { %297 = vadd.xlane.f32.xlu0 %v296_v39 }
 0x2cf   :  { %v2219_v40 = vpop.eup %2218 }
 0x2d0   :  { %v299_v41 = vsel %vm130_vm3, %v2219_v40, 0.0  ;;  %v539_v43 = vpop.permute.xlu1 %538 }
 0x2d1   :  { %300 = vadd.xlane.f32.xlu1 %v299_v41 }
 0x2e2   :  { %536 = vrot.lane.b32.xlu1 %v2399_v23, %s2285_s12 }
 0x2e3   :  { %458 = vrot.lane.b32.xlu0 %v2391_v21, %s2285_s12 }
 0x35a   :  { %v298_v44 = vpop.xlane.xlu0 %297 }
 0x35b   :  { %2220 = vrcp.f32 %v298_v44 }
 0x35e   :  { %v301_v45 = vpop.xlane.xlu1 %300  ;;  %v459_v50 = vpop.permute.xlu0 %458 }
 0x35f   :  { %2222 = vrcp.f32 %v301_v45 }
 0x362   :  { %v537_v51 = vpop.permute.xlu1 %536 }
 0x365   :  { %v2221_v46 = vpop.eup %2220 }
 0x366   :  { %v304_v47 = vmul.f32 %v2221_v46, %v2217_v38 }
 0x368   :  { %2007 = vmatmul.mubr.msk.f32.vlgmr.msra.gmra.mrb[0].mxu0 %vm130_vm3, %v304_v47 }
 0x369   :  { %v2223_v48 = vpop.eup %2222  ;;  %2015 = vmatpush3.xpose.msk.msra.mxu0 %vm130_vm3, %v461_v42  ;;  %2016 = vmatprep.mubr.msk.f32.mxu0 %vm2281_vm2, %v2280_v14 }
 0x36a   :  { %v305_v49 = vmul.f32 %v2223_v48, %v2219_v40  ;;  %2024 = vmatprep.subr.mxu0 %v2280_v14 }
 0x36c   :  { %2012 = vmatmul.mubr.msk.f32.vlgmr.msra.gmra.mrb[6].mxu1 %vm130_vm3, %v305_v49  ;;  %2017 = vmatmul.mubr.msk.f32.vlgmr.msra.gmra.mrb[2].mxu0 %vm130_vm3, %v459_v50 }
 0x36d   :  { %2020 = vmatpush3.xpose.msk.msra.mxu1 %vm130_vm3, %v539_v43  ;;  %2021 = vmatprep.mubr.msk.f32.mxu1 %vm2281_vm2, %v2280_v14 }
 0x36e   :  { %2029 = vmatprep.subr.mxu1 %v2280_v14  ;;  %2026 = vmatprep.mubr.msk.f32.mxu0 %vm2281_vm2, %v2280_v14 }
 0x370   :  { %2022 = vmatmul.mubr.msk.f32.vlgmr.msra.gmra.mrb[8].mxu1 %vm130_vm3, %v537_v51 }
 0x371   :  { %2031 = vmatprep.mubr.msk.f32.mxu1 %vm2281_vm2, %v2280_v14 }
 0x43b   :  { %v2434_v52 = vpop.f32.mrb[0].mxu0 }
 0x43c   :  { %v2008_v53 = vpop.f32.mrb[1].mxu0 }
 0x43f   :  { %v2436_v54 = vpop.f32.mrb[6].mxu1  ;;  %v532_v55 = vpop.f32.mrb[2].mxu0 }
 0x440   :  { %v2013_v56 = vpop.f32.mrb[7].mxu1  ;;  %v2018_v57 = vpop.f32.mrb[3].mxu0  ;;  %v614_v58 = vsel %vm130_vm3, %v532_v55, -inf }
 0x441   :  { %615 = vmax.xlane.f32.xlu1 %v614_v58 }
 0x443   :  { %v610_v59 = vpop.f32.mrb[8].mxu1 }
 0x444   :  { %v2023_v60 = vpop.f32.mrb[9].mxu1  ;;  %v617_v61 = vsel %vm130_vm3, %v610_v59, -inf }
 0x445   :  { %618 = vmax.xlane.f32.xlu0 %v617_v61 }
 0x452   :  { %636 = vrot.lane.b32.xlu1 %v2382_v18, %s2286_s13 }
 0x456   :  { %790 = vrot.lane.b32.xlu1 %v2382_v18, %s2287_s14 }
 0x45a   :  { %868 = vrot.lane.b32.xlu1 %v2385_v19, %s2287_s14 }
 0x45b   :  { %712 = vrot.lane.b32.xlu0 %v2385_v19, %s2286_s13 }
 0x45f   :  { %788 = vrot.lane.b32.xlu0 %v2391_v21, %s2288_s15 }
 0x4ce   :  { %v616_v62 = vpop.xlane.xlu1 %615 }
 0x4cf   :  { %v620_v63 = vsub.f32 %v532_v55, %v616_v62 }
 0x4d1   :  { %v622_v3 = vmul.f32 1.442695, %v620_v63 }
 0x4d2   :  { %v637_v5 = vpop.permute.xlu1 %636  ;;  %v619_v6 = vpop.xlane.xlu0 %618 }
 0x4d3   :  { %2224 = vpow2.f32 %v622_v3  ;;  %v621_v7 = vsub.f32 %v610_v59, %v619_v6  ;;  %2025 = vmatpush3.msra.mxu0 %v637_v5 }
 0x4d4   :  { %2034 = vmatprep.subr.mxu0 %v2280_v14 }
 0x4d5   :  { %v624_v8 = vmul.f32 1.442695, %v621_v7 }
 0x4d6   :  { %v713_v9 = vpop.permute.xlu0 %712  ;;  %v791_v17 = vpop.permute.xlu1 %790 }
 0x4d7   :  { %2226 = vpow2.f32 %v624_v8  ;;  %2030 = vmatpush3.msra.mxu1 %v713_v9 }
 0x4d8   :  { %2039 = vmatprep.subr.mxu1 %v2280_v14 }
 0x4da   :  { %v869_v20 = vpop.permute.xlu1 %868  ;;  %v789_v29 = vpop.permute.xlu0 %788 }
 0x4dd   :  { %v2225_v11 = vpop.eup %2224 }
 0x4de   :  { %v626_v12 = vsel %vm130_vm3, %v2225_v11, 0.0 }
 0x4df   :  { %627 = vadd.xlane.f32.xlu1 %v626_v12 }
 0x4e1   :  { %v2227_v15 = vpop.eup %2226 }
 0x4e2   :  { %v629_v16 = vsel %vm130_vm3, %v2227_v15, 0.0 }
 0x4e3   :  { %630 = vadd.xlane.f32.xlu1 %v629_v16  ;;  %v2211_v16 = vpack.i.bf16 %v2349_v4, %v2342_v2 }
 0x4f4   :  { %866 = vrot.lane.b32.xlu1 %v2399_v23, %s2288_s15 }
 0x56c   :  { %v628_v22 = vpop.xlane.xlu1 %627 }
 0x56d   :  { %2228 = vrcp.f32 %v628_v22 }
 0x570   :  { %v631_v24 = vpop.xlane.xlu1 %630 }
 0x571   :  { %2230 = vrcp.f32 %v631_v24 }
 0x574   :  { %v867_v30 = vpop.permute.xlu1 %866 }
 0x577   :  { %v2229_v25 = vpop.eup %2228 }
 0x578   :  { %v634_v26 = vmul.f32 %v2229_v25, %v2225_v11 }
 0x57a   :  { %2027 = vmatmul.mubr.msk.f32.vlgmr.msra.gmra.mrb[4].mxu0 %vm130_vm3, %v634_v26 }
 0x57b   :  { %v2231_v27 = vpop.eup %2230  ;;  %2035 = vmatpush3.xpose.msk.msra.mxu0 %vm130_vm3, %v791_v17  ;;  %2036 = vmatprep.mubr.msk.f32.mxu0 %vm2281_vm2, %v2280_v14 }
 0x57c   :  { %v635_v28 = vmul.f32 %v2231_v27, %v2227_v15  ;;  %2044 = vmatprep.subr.mxu0 %v2280_v14 }
 0x57e   :  { %2032 = vmatmul.mubr.msk.f32.vlgmr.msra.gmra.mrb[10].mxu1 %vm130_vm3, %v635_v28  ;;  %2037 = vmatmul.mubr.msk.f32.vlgmr.msra.gmra.mrb[6].mxu0 %vm130_vm3, %v789_v29 }
 0x57f   :  { %2040 = vmatpush3.xpose.msk.msra.mxu1 %vm130_vm3, %v869_v20  ;;  %2041 = vmatprep.mubr.msk.f32.mxu1 %vm2281_vm2, %v2280_v14 }
 0x580   :  { %2049 = vmatprep.subr.mxu1 %v2280_v14  ;;  %2046 = vmatprep.mubr.msk.f32.mxu0 %vm2281_vm2, %v2280_v14 }
 0x582   :  { %2042 = vmatmul.mubr.msk.f32.vlgmr.msra.gmra.mrb[12].mxu1 %vm130_vm3, %v867_v30 }
 0x583   :  { %2051 = vmatprep.mubr.msk.f32.mxu1 %vm2281_vm2, %v2280_v14 }
 0x64d   :  { %v2466_v31 = vpop.f32.mrb[4].mxu0 }
 0x64e   :  { %v2028_v32 = vpop.f32.mrb[5].mxu0 }
 0x651   :  { %v2468_v33 = vpop.f32.mrb[10].mxu1  ;;  %v862_v34 = vpop.f32.mrb[6].mxu0 }
 0x652   :  { %v2033_v35 = vpop.f32.mrb[11].mxu1  ;;  %v2038_v36 = vpop.f32.mrb[7].mxu0  ;;  %v944_v37 = vsel %vm130_vm3, %v862_v34, -inf }
 0x653   :  { %945 = vmax.xlane.f32.xlu0 %v944_v37 }
 0x655   :  { %v940_v38 = vpop.f32.mrb[12].mxu1 }
 0x656   :  { %v2043_v39 = vpop.f32.mrb[13].mxu1  ;;  %v947_v40 = vsel %vm130_vm3, %v940_v38, -inf }
 0x657   :  { %948 = vmax.xlane.f32.xlu1 %v947_v40 }
 0x668   :  { %966 = vrot.lane.b32.xlu1 %v2382_v18, %s2289_s16 }
 0x669   :  { %1042 = vrot.lane.b32.xlu0 %v2385_v19, %s2289_s16 }
 0x66c   :  { %1120 = vrot.lane.b32.xlu1 %v2382_v18, %s2290_s17 }
 0x670   :  { %1198 = vrot.lane.b32.xlu1 %v2385_v19, %s2290_s17 }
 0x674   :  { %1196 = vrot.lane.b32.xlu1 %v2399_v23, %s2291_s18 }
 0x6e0   :  { %v946_v41 = vpop.xlane.xlu0 %945 }
 0x6e1   :  { %v950_v42 = vsub.f32 %v862_v34, %v946_v41 }
 0x6e3   :  { %v952_v43 = vmul.f32 1.442695, %v950_v42 }
 0x6e4   :  { %v1043_v44 = vpop.permute.xlu0 %1042  ;;  %v949_v45 = vpop.xlane.xlu1 %948 }
 0x6e5   :  { %2232 = vpow2.f32 %v952_v43  ;;  %v951_v46 = vsub.f32 %v940_v38, %v949_v45  ;;  %2050 = vmatpush3.msra.mxu1 %v1043_v44 }
 0x6e6   :  { %2059 = vmatprep.subr.mxu1 %v2280_v14 }
 0x6e7   :  { %v954_v47 = vmul.f32 1.442695, %v951_v46 }
 0x6e8   :  { %v967_v48 = vpop.permute.xlu1 %966 }
 0x6e9   :  { %2234 = vpow2.f32 %v954_v47  ;;  %2045 = vmatpush3.msra.mxu0 %v967_v48 }
 0x6ea   :  { %2054 = vmatprep.subr.mxu0 %v2280_v14 }
 0x6ec   :  { %v1121_v56 = vpop.permute.xlu1 %1120 }
 0x6ef   :  { %v2233_v49 = vpop.eup %2232 }
 0x6f0   :  { %v956_v50 = vsel %vm130_vm3, %v2233_v49, 0.0  ;;  %v1199_v60 = vpop.permute.xlu1 %1198 }
 0x6f1   :  { %957 = vadd.xlane.f32.xlu0 %v956_v50 }
 0x6f3   :  { %v2235_v23 = vpop.eup %2234 }
 0x6f4   :  { %v959_v51 = vsel %vm130_vm3, %v2235_v23, 0.0  ;;  %v1197_v62 = vpop.permute.xlu1 %1196 }
 0x6f5   :  { %960 = vadd.xlane.f32.xlu0 %v959_v51 }
 0x70b   :  { %1118 = vrot.lane.b32.xlu0 %v2391_v21, %s2291_s18 }
 0x77e   :  { %v958_v53 = vpop.xlane.xlu0 %957 }
 0x77f   :  { %2236 = vrcp.f32 %v958_v53 }
 0x782   :  { %v961_v55 = vpop.xlane.xlu0 %960 }
 0x783   :  { %2238 = vrcp.f32 %v961_v55 }
 0x786   :  { %v1119_v21 = vpop.permute.xlu0 %1118 }
 0x789   :  { %v2237_v57 = vpop.eup %2236 }
 0x78a   :  { %v964_v58 = vmul.f32 %v2237_v57, %v2233_v49 }
 0x78c   :  { %2047 = vmatmul.mubr.msk.f32.vlgmr.msra.gmra.mrb[8].mxu0 %vm130_vm3, %v964_v58  ;;  %v1904_v58 = vld [vmem:[%s2637_s4 + $0x1] ss:$0 sm:$0xff] }
 0x78d   :  { %v2239_v59 = vpop.eup %2238  ;;  %2055 = vmatpush3.xpose.msk.msra.mxu0 %vm130_vm3, %v1121_v56  ;;  %2056 = vmatprep.mubr.msk.f32.mxu0 %vm2281_vm2, %v2280_v14 }
 0x78e   :  { %v965_v61 = vmul.f32 %v2239_v59, %v2235_v23  ;;  %2064 = vmatprep.subr.mxu0 %v2280_v14 }
 0x790   :  { %2052 = vmatmul.mubr.msk.f32.vlgmr.msra.gmra.mrb[14].mxu1 %vm130_vm3, %v965_v61  ;;  %2057 = vmatmul.mubr.msk.f32.vlgmr.msra.gmra.mrb[10].mxu0 %vm130_vm3, %v1119_v21 }
 0x791   :  { %2060 = vmatpush3.xpose.msk.msra.mxu1 %vm130_vm3, %v1199_v60  ;;  %2061 = vmatprep.mubr.msk.f32.mxu1 %vm2281_vm2, %v2280_v14 }
 0x792   :  { %2069 = vmatprep.subr.mxu1 %v2280_v14  ;;  %2066 = vmatprep.mubr.msk.f32.mxu0 %vm2281_vm2, %v2280_v14 }
 0x794   :  { %2062 = vmatmul.mubr.msk.f32.vlgmr.msra.gmra.mrb[16].mxu1 %vm130_vm3, %v1197_v62 }
 0x795   :  { %2071 = vmatprep.mubr.msk.f32.mxu1 %vm2281_vm2, %v2280_v14  ;;  %v2206_v14 = vpack.i.bf16 %v2337_v1, %v2332_v0 }
 0x85f   :  { %v1038_v63 = vpop.f32.mrb[8].mxu0 }
 0x860   :  { %v2048_v3 = vpop.f32.mrb[9].mxu0 }
 0x863   :  { %v1114_v5 = vpop.f32.mrb[14].mxu1  ;;  %v1192_v6 = vpop.f32.mrb[10].mxu0 }
 0x864   :  { %v2053_v7 = vpop.f32.mrb[15].mxu1  ;;  %v2058_v8 = vpop.f32.mrb[11].mxu0  ;;  %v1274_v9 = vsel %vm130_vm3, %v1192_v6, -inf }
 0x865   :  { %1275 = vmax.xlane.f32.xlu0 %v1274_v9 }
 0x867   :  { %v1270_v11 = vpop.f32.mrb[16].mxu1 }
 0x868   :  { %v2063_v12 = vpop.f32.mrb[17].mxu1  ;;  %v1277_v15 = vsel %vm130_vm3, %v1270_v11, -inf }
 0x869   :  { %1278 = vmax.xlane.f32.xlu1 %v1277_v15  ;;  %v1629_v15 = vld [vmem:[%s2635_s2 + $0x8] sm:$0xff] }
 0x87a   :  { %1296 = vrot.lane.b32.xlu1 %v2382_v18, %s2292_s19 }
 0x87e   :  { %2207 = vrot.lane.b32.xlu1 %v2206_v14, %s2293_s20  ;;  %v1630_v14 = vld [vmem:[%s2635_s2 + $0x18] sm:$0xff] }
 0x882   :  { %2212 = vrot.lane.b32.xlu1 %v2211_v16, %s2293_s20  ;;  %v2147_v16 = vpack.c.bf16 %v1630_v14, %v1629_v15 }
 0x886   :  { %1452 = vrot.lane.b32.xlu1 %v2468_v33, %s2294_s21 }
 0x88a   :  { %1460 = vrot.lane.b32.xlu1 %v1114_v5, %s2295_s22 }
 0x8f2   :  { %v1276_v17 = vpop.xlane.xlu0 %1275 }
 0x8f3   :  { %v1280_v20 = vsub.f32 %v1192_v6, %v1276_v17  ;;  %v1631_v17 = vld [vmem:[%s2635_s2 + $0x28] sm:$0xff] }
 0x8f5   :  { %v1282_v22 = vmul.f32 1.442695, %v1280_v20  ;;  %v1632_v20 = vld [vmem:[%s2635_s2 + $0x38] sm:$0xff] }
 0x8f6   :  { %v1279_v24 = vpop.xlane.xlu1 %1278 }
 0x8f7   :  { %2240 = vpow2.f32 %v1282_v22  ;;  %v1281_v18 = vsub.f32 %v1270_v11, %v1279_v24  ;;  %v2151_v22 = vpack.c.bf16 %v1632_v20, %v1631_v17  ;;  %v1721_v24 = vld [vmem:[%s2636_s3] sm:$0xff] }
 0x8f9   :  { %v1284_v25 = vmul.f32 1.442695, %v1281_v18  ;;  %v1722_v18 = vld [vmem:[%s2636_s3 + $0x8] sm:$0xff] }
 0x8fa   :  { %v1297_v0 = vpop.permute.xlu1 %1296 }
 0x8fb   :  { %2242 = vpow2.f32 %v1284_v25  ;;  %2065 = vmatpush3.msra.mxu0 %v1297_v0  ;;  %v1723_v25 = vld [vmem:[%s2636_s3 + $0x10] sm:$0xff]  ;;  %v2155_v0 = vpack.c.bf16 %v1722_v18, %v1721_v24 }
 0x8fd   :  { %2156 = vmatprep.subr.bf16.mxu0 %v2155_v0 }
 0x8fe   :  { %v2208_v28 = vpop.permute.xlu1 %2207 }
 0x8ff   :  { %v2210_v29 = vunpack.i.h.bf16 %v2208_v28  ;;  %v2209_v30 = vunpack.i.l.bf16 %v2208_v28  ;;  %v1727_v28 = vld [vmem:[%s2636_s3 + $0x30] sm:$0xff] }
 0x901   :  { %v2241_v1 = vpop.eup %2240  ;;  %v2139_v33 = vpack.c.bf16 %v2210_v29, %v2209_v30  ;;  %v1728_v29 = vld [vmem:[%s2636_s3 + $0x38] sm:$0xff] }
 0x902   :  { %v1286_v2 = vsel %vm130_vm3, %v2241_v1, 0.0  ;;  %v2213_v36 = vpop.permute.xlu1 %2212  ;;  %v2167_v30 = vpack.c.bf16 %v1728_v29, %v1727_v28  ;;  %v1913_v28 = vld [vmem:[%s2637_s4 + $0x6] ss:$0 sm:$0xff] }
 0x903   :  { %1287 = vadd.xlane.f32.xlu0 %v1286_v2  ;;  %v2215_v37 = vunpack.i.h.bf16 %v2213_v36  ;;  %v2214_v38 = vunpack.i.l.bf16 %v2213_v36  ;;  %v1732_v36 = vld [vmem:[%s2636_s3 + $0x58] sm:$0xff] }
 0x905   :  { %v2243_v4 = vpop.eup %2242  ;;  %v2143_v39 = vpack.c.bf16 %v2215_v37, %v2214_v38  ;;  %v1733_v38 = vld [vmem:[%s2636_s3 + $0x60] sm:$0xff] }
 0x906   :  { %v1289_v26 = vsel %vm130_vm3, %v2243_v4, 0.0  ;;  %v1453_v46 = vpop.permute.xlu1 %1452 }
 0x907   :  { %1290 = vadd.xlane.f32.xlu0 %v1289_v26  ;;  %v1473_v53 = vsel %vm130_vm3, %v2436_v54, %v1453_v46  ;;  %v1726_v26 = vld [vmem:[%s2636_s3 + $0x28] sm:$0xff]  ;;  %v1907_v46 = vld [vmem:[%s2637_s4 + $0x2] ss:$0 sm:$0xff] }
 0x90a   :  { %v1461_v49 = vpop.permute.xlu1 %1460 }
 0x90b   :  { %v1476_v55 = vsel %vm1474_vm5, %v1473_v53, %v1461_v49 }
 0x91d   :  { %1372 = vrot.lane.b32.xlu0 %v2385_v19, %s2292_s19 }
 0x921   :  { %1450 = vrot.lane.b32.xlu0 %v2466_v31, %s2294_s21 }
 0x925   :  { %1458 = vrot.lane.b32.xlu0 %v1038_v63, %s2295_s22 }
 0x990   :  { %v1288_v27 = vpop.xlane.xlu0 %1287 }
 0x991   :  { %2244 = vrcp.f32 %v1288_v27 }
 0x994   :  { %v1291_v32 = vpop.xlane.xlu0 %1290 }
 0x995   :  { %2246 = vrcp.f32 %v1291_v32  ;;  %v1729_v32 = vld [vmem:[%s2636_s3 + $0x40] sm:$0xff] }
 0x998   :  { %v1373_v34 = vpop.permute.xlu0 %1372 }
 0x999   :  { %2070 = vmatpush3.msra.mxu1 %v1373_v34 }
 0x99a   :  { %2140 = vmatprep.subr.bf16.mxu1 %v2139_v33 }
 0x99b   :  { %v2245_v35 = vpop.eup %2244 }
 0x99c   :  { %v1294_v19 = vmul.f32 %v2245_v35, %v2241_v1  ;;  %v1451_v45 = vpop.permute.xlu0 %1450  ;;  %v1724_v1 = vld [vmem:[%s2636_s3 + $0x18] sm:$0xff]  ;;  %v1731_v35 = vld [vmem:[%s2636_s3 + $0x50] sm:$0xff] }
 0x99d   :  { %v1472_v48 = vsel %vm130_vm3, %v2434_v52, %v1451_v45  ;;  %v2159_v2 = vpack.c.bf16 %v1724_v1, %v1723_v25  ;;  %v2175_v37 = vpack.c.bf16 %v1732_v36, %v1731_v35 }
 0x99e   :  { %2067 = vmatmul.mubr.msk.f32.vlgmr.msra.gmra.mrb[12].mxu0 %vm130_vm3, %v1294_v19  ;;  %v1734_v19 = vld [vmem:[%s2636_s3 + $0x68] sm:$0xff] }
 0x99f   :  { %v2247_v31 = vpop.eup %2246  ;;  %2158 = vmatpush3.bf16.msra.mxu0 %v2155_v0 }
 0x9a0   :  { %v1295_v40 = vmul.f32 %v2247_v31, %v2243_v4  ;;  %v1459_v47 = vpop.permute.xlu0 %1458  ;;  %v1725_v4 = vld [vmem:[%s2636_s3 + $0x20] sm:$0xff]  ;;  %2160 = vmatprep.subr.bf16.mxu0 %v2159_v2  ;;  %v2179_v31 = vpack.c.bf16 %v1734_v19, %v1733_v38 }
 0x9a1   :  { %v1475_v50 = vsel %vm1474_vm5, %v1472_v48, %v1459_v47  ;;  %v2163_v27 = vpack.c.bf16 %v1726_v26, %v1725_v4  ;;  %v1908_v48 = vld [vmem:[%s2637_s4 + $0x3] ss:$0 sm:$0xff] }
 0x9a2   :  { %2072 = vmatmul.mubr.msk.f32.vlgmr.msra.gmra.mrb[18].mxu1 %vm130_vm3, %v1295_v40 }
 0x9a3   :  { %2142 = vmatpush3.bf16.msra.mxu1 %v2139_v33  ;;  %2162 = vmatpush3.bf16.msra.mxu0 %v2159_v2  ;;  %v1730_v33 = vld [vmem:[%s2636_s3 + $0x48] sm:$0xff] }
 0x9a4   :  { %2144 = vmatprep.subr.bf16.mxu1 %v2143_v39  ;;  %2164 = vmatprep.subr.bf16.mxu0 %v2163_v27  ;;  %v2171_v34 = vpack.c.bf16 %v1730_v33, %v1729_v32  ;;  %v1914_v33 = vld [vmem:[%s2637_s4 + $0x7] ss:$0 sm:$0xff] }
 0x9a7   :  { %2146 = vmatpush3.bf16.msra.mxu1 %v2143_v39  ;;  %2166 = vmatpush3.bf16.msra.mxu0 %v2163_v27 }
 0x9a8   :  { %2148 = vmatprep.subr.bf16.mxu1 %v2147_v16  ;;  %2168 = vmatprep.subr.bf16.mxu0 %v2167_v30 }
 0x9ab   :  { %2170 = vmatpush3.bf16.msra.mxu0 %v2167_v30 }
 0x9ac   :  { %2172 = vmatprep.subr.bf16.mxu0 %v2171_v34 }
 0x9af   :  { %2174 = vmatpush3.bf16.msra.mxu0 %v2171_v34 }
 0x9b0   :  { %2176 = vmatprep.subr.bf16.mxu0 %v2175_v37 }
 0x9b3   :  { %2178 = vmatpush3.bf16.msra.mxu0 %v2175_v37 }
 0x9b4   :  { %2180 = vmatprep.subr.bf16.mxu0 %v2179_v31 }
 0x9b7   :  { %2182 = vmatpush3.bf16.msra.mxu0 %v2179_v31 }
 0xa71   :  { %v1368_v41 = vpop.f32.mrb[12].mxu0 }
 0xa72   :  { %1466 = vrot.lane.b32.xlu0 %v1368_v41, %s2296_s23  ;;  %v2068_v42 = vpop.f32.mrb[13].mxu0 }
 0xa75   :  { %v1444_v43 = vpop.f32.mrb[18].mxu1 }
 0xa76   :  { %1468 = vrot.lane.b32.xlu1 %v1444_v43, %s2296_s23  ;;  %v2073_v44 = vpop.f32.mrb[19].mxu1  ;;  %s2297_s23 = smov [#allocation2]  }
 0xa77   :  { %s1866_s24 = sshll.u32 %s2297_s23, 4  ;;  %s1867_s24 = int_to_ptr.vmem [resolvable:$true] %s1866_s24 }
 0xa78   :  { %s2256_s25 = scalar_lea.vmem %s1867_s24, 256  ;;  %p2261_p1 = scmp.lt.s32.totalorder %s1867_s24, %s1867_s24 }
 0xa79   :  { %p2257_p0 = scmp.ne.s32.totalorder %s1867_s24, %s2256_s25  ;;  %p2262_p2 = scmp.lt.s32.totalorder %s2256_s25, %s2256_s25 }
 0xa7b   :  { %p2263_p3 = por %p2262_p2, %p2261_p1 }
 0xa7d   :  { %p2264_p4 = pnand %p2263_p3, %p2257_p0 }
 0xae4   :  { %v1467_v23 = vpop.permute.xlu0 %1466 }
 0xae5   :  { %v1478_v51 = vsel %vm1477_vm4, %v1475_v50, %v1467_v23 }
 0xae6   :  { %2082 = vmatprep.mubr.msk.f32.mxu1 %vm43_vm1, %v1478_v51 }
 0xae8   :  { %v1469_v56 = vpop.permute.xlu1 %1468 }
 0xae9   :  { %v1479_v57 = vsel %vm1477_vm4, %v1476_v55, %v1469_v56  ;;  %v1735_v56 = vld [vmem:[%s2636_s3 + $0x70] sm:$0xff] }
 0xaea   :  { %2083 = vmatmul.mubr.msk.f32.vlgmr.msra.gmra.mrb[20].mxu1 %vm43_vm1, %v1479_v57  ;;  %v1736_v57 = vld [vmem:[%s2636_s3 + $0x78] sm:$0xff] }
 0xaeb   :  { %2150 = vmatpush3.bf16.msra.mxu1 %v2147_v16 }
 0xaec   :  { %2152 = vmatprep.subr.bf16.mxu1 %v2151_v22 }
 0xaef   :  { %2154 = vmatpush3.bf16.msra.mxu1 %v2151_v22 }
 0xbbd   :  { %v2084_v59 = vpop.f32.mrb[20].mxu1 }
 0xbbe   :  { %v1583_v52 = vadd.f32 %v2084_v59, %v1904_v58  ;;  %v1577_v60 = vpop.f32.mrb[21].mxu1  ;;  %v1909_v59 = vld [vmem:[%s2637_s4 + $0x4] ss:$0 sm:$0xff] }
 0xbbf   :  { %v1578_v61 = vadd.f32 %v1904_v58, %v1577_v60  ;;  %v2183_v58 = vpack.c.bf16 %v1736_v57, %v1735_v56 }
 0xbc0   :  { %v1587_v21 = vadd.f32 %v1583_v52, %v2369_v13 }
 0xbc1   :  { %v1586_v62 = vadd.f32 %v1578_v61, %v2362_v10  ;;  %2184 = vmatprep.subr.bf16.mxu0 %v2183_v58 }
 0xbc2   :  { %v1593_v63 = vsel %vm43_vm1, %v1587_v21, 0.0  ;;  %2186 = vmatpush3.bf16.msra.mxu0 %v2183_v58 }
 0xbc3   :  { %1594 = vadd.xlane.f32.xlu1 %v1593_v63  ;;  %v1590_v54 = vsel %vm43_vm1, %v1586_v62, 0.0 }
 0xbc4   :  { %1591 = vadd.xlane.f32.xlu0 %v1590_v54  ;;  %v1912_v54 = vld [vmem:[%s2637_s4 + $0x5] ss:$0 sm:$0xff] }
 0xc50   :  { %v1595_v3 = vpop.xlane.xlu1 %1594 }
 0xc51   :  { %v1598_v5 = vmul.f32 0.03125, %v1595_v3  ;;  %v1592_v6 = vpop.xlane.xlu0 %1591 }
 0xc52   :  { %v1597_v7 = vmul.f32 0.03125, %v1592_v6 }
 0xc53   :  { %v2527_v8 = vsub.f32 %v1587_v21, %v1598_v5 }
 0xc54   :  { %v1599_v9 = vsub.f32 %v1586_v62, %v1597_v7 }
 0xc55   :  { %v1602_v13 = vmul.f32 %v2527_v8, %v2527_v8 }
 0xc56   :  { %v1601_v11 = vmul.f32 %v1599_v9, %v1599_v9 }
 0xc57   :  { %v1606_v10 = vsel %vm43_vm1, %v1602_v13, 0.0 }
 0xc58   :  { %v1603_v12 = vsel %vm43_vm1, %v1601_v11, 0.0 }
 0xc59   :  { %1604 = vadd.xlane.f32.xlu0 %v1603_v12 }
 0xc5d   :  { %1607 = vadd.xlane.f32.xlu0 %v1606_v10 }
 0xce6   :  { %v1605_v39 = vpop.xlane.xlu0 %1604 }
 0xce7   :  { %v1609_v40 = vmul.f32 0.03125, %v1605_v39 }
 0xce9   :  { %v1611_v41 = vadd.f32 1e-05, %v1609_v40 }
 0xcea   :  { %v1608_v42 = vpop.xlane.xlu0 %1607 }
 0xceb   :  { %2248 = vrsqrt.f32 %v1611_v41  ;;  %v1610_v43 = vmul.f32 0.03125, %v1608_v42 }
 0xced   :  { %v1612_v44 = vadd.f32 1e-05, %v1610_v43 }
 0xcef   :  { %2250 = vrsqrt.f32 %v1612_v44 }
 0xcf5   :  { %v2249_v45 = vpop.eup %2248 }
 0xcf6   :  { %v1615_v47 = vmul.f32 %v2249_v45, %v1599_v9 }
 0xcf8   :  { %v1621_v49 = vmul.f32 %v1907_v46, %v1615_v47 }
 0xcf9   :  { %v2251_v50 = vpop.eup %2250 }
 0xcfa   :  { %v1616_v23 = vmul.f32 %v2251_v50, %v2527_v8  ;;  %v1627_v51 = vadd.f32 %v1908_v48, %v1621_v49 }
 0xcfc   :  { %v1622_v53 = vmul.f32 %v1907_v46, %v1616_v23  ;;  %2093 = vmatprep.mubr.msk.f32.mxu1 %vm43_vm1, %v1627_v51 }
 0xcfe   :  { %v1628_v55 = vadd.f32 %v1908_v48, %v1622_v53 }
 0xd00   :  { %2094 = vmatmul.mubr.msk.f32.vlgmr.msra.gmra.mrb[22].mxu1 %vm43_vm1, %v1628_v55 }
 0xdd3   :  { %v2095_v52 = vpop.f32.mrb[22].mxu1 }
 0xdd4   :  { %v1716_v60 = vadd.f32 %v2095_v52, %v1909_v59  ;;  %v1710_v61 = vpop.f32.mrb[23].mxu1 }
 0xdd5   :  { %v1711_v21 = vadd.f32 %v1909_v59, %v1710_v61 }
 0xdd6   :  { %v1720_v63 = vmax.f32 %v1716_v60, 0.0 }
 0xdd7   :  { %v1719_v62 = vmax.f32 %v1711_v21, 0.0 }
 0xdd9   :  { %2128 = vmatprep.mubr.f32.mxu0 %v1719_v62 }
 0xdda   :  { %2129 = vmatmul.mubr.f32.vlgmr.msra.gmra.mrb[14].mxu0 %v1720_v63 }
 0xead   :  { %v2130_v3 = vpop.f32.mrb[14].mxu0 }
 0xeae   :  { %v1814_v5 = vadd.f32 %v2130_v3, %v1912_v54  ;;  %v1808_v6 = vpop.f32.mrb[15].mxu0 }
 0xeaf   :  { %v1809_v7 = vadd.f32 %v1912_v54, %v1808_v6 }
 0xeb0   :  { %v1818_v8 = vadd.f32 %v1814_v5, %v1628_v55 }
 0xeb1   :  { %v1817_v9 = vadd.f32 %v1809_v7, %v1627_v51 }
 0xeb2   :  { %v1824_v11 = vsel %vm43_vm1, %v1818_v8, 0.0 }
 0xeb3   :  { %1825 = vadd.xlane.f32.xlu0 %v1824_v11  ;;  %v1821_v12 = vsel %vm43_vm1, %v1817_v9, 0.0 }
 0xeb4   :  { %1822 = vadd.xlane.f32.xlu1 %v1821_v12 }
 0xf40   :  { %v1826_v13 = vpop.xlane.xlu0 %1825 }
 0xf41   :  { %v1828_v10 = vmul.f32 0.03125, %v1826_v13  ;;  %v1823_v15 = vpop.xlane.xlu1 %1822 }
 0xf42   :  { %v1827_v14 = vmul.f32 0.03125, %v1823_v15 }
 0xf43   :  { %v1830_v16 = vsub.f32 %v1818_v8, %v1828_v10 }
 0xf44   :  { %v1829_v17 = vsub.f32 %v1817_v9, %v1827_v14 }
 0xf45   :  { %v1832_v20 = vmul.f32 %v1830_v16, %v1830_v16 }
 0xf46   :  { %v1831_v22 = vmul.f32 %v1829_v17, %v1829_v17 }
 0xf47   :  { %v1836_v24 = vsel %vm43_vm1, %v1832_v20, 0.0 }
 0xf48   :  { %1837 = vadd.xlane.f32.xlu0 %v1836_v24  ;;  %v1833_v18 = vsel %vm43_vm1, %v1831_v22, 0.0 }
 0xf49   :  { %1834 = vadd.xlane.f32.xlu1 %v1833_v18 }
 0xfd5   :  { %v1838_v25 = vpop.xlane.xlu0 %1837 }
 0xfd6   :  { %v1840_v0 = vmul.f32 0.03125, %v1838_v25  ;;  %v1835_v1 = vpop.xlane.xlu1 %1834 }
 0xfd7   :  { %v1839_v2 = vmul.f32 0.03125, %v1835_v1 }
 0xfd8   :  { %v1842_v4 = vadd.f32 1e-05, %v1840_v0 }
 0xfd9   :  { %v1841_v26 = vadd.f32 1e-05, %v1839_v2 }
 0xfda   :  { %2252 = vrsqrt.f32 %v1842_v4 }
 0xfdb   :  { %2254 = vrsqrt.f32 %v1841_v26 }
 0xfe4   :  { %v2253_v27 = vpop.eup %2252 }
 0xfe5   :  { %v2255_v29 = vpop.eup %2254  ;;  %v1846_v30 = vmul.f32 %v2253_v27, %v1830_v16 }
 0xfe6   :  { %v1845_v32 = vmul.f32 %v2255_v29, %v1829_v17 }
 0xfe7   :  { %v1852_v34 = vmul.f32 %v1913_v28, %v1846_v30 }
 0xfe8   :  { %v1851_v35 = vmul.f32 %v1913_v28, %v1845_v32 }
 0xfe9   :  { %v1858_v36 = vadd.f32 %v1914_v33, %v1852_v34 }
 0xfea   :  { %v1857_v37 = vadd.f32 %v1914_v33, %v1851_v35 }
 0xfeb   :  { %1860 = vst.msk [vmem:[#allocation2 + $0x8] sm:$0xff] %vm43_vm1, %v1858_v36 }
 0xfec   :  { %1859 = vst.msk [vmem:[#allocation2] sm:$0xff] %vm43_vm1, %v1857_v37 }
 0xfed   :  { %2267 = shalt.err (!%p2264_p4)
}
 0xfee   :  { %s2268_s27 = scalar_lea.hbm %s2638_s5, 256 }
 0xfef   :  { %p2269_p5 = scmp.ne.s32.totalorder %s2638_s5, %s2268_s27  ;;  %p2272_p6 = scmp.lt.u32.totalorder %s2268_s27, %s2638_s5 }
 0xff1   :  { %p2274_p7 = pnand %p2272_p6, %p2269_p5 }
 0xff3   :  { %2277 = shalt.err (!%p2274_p7)
}
 0xff4   :  { %s2298_s7 = smov 128  }
 0xff5   :  { %1872 = dma.vmem_to_hbm [thread:$0]  %s1867_s24, 256, %s2638_s5, [#allocation3], %s2298_s7, %s2298_s7, %s2294_s21  }
 0xff6   :  { %2278 = dma.done.wait [#allocation3], 256  }
 0xff7   :  { %2279 = vsyncadd [#allocation3], 4294967040 }
 0xff8   :  { %1876 = vsyncpa [#allocation3], 1 }

</bundles_post_ra>
